<compile_context>
chip_gen: v7x
topology: tpu7x:2x2x1
jax: 0.10.0
libtpu: 0.0.40
codegen_flags: <defaults>
</compile_context>

<pallas_src>
import jax
import jax.numpy as jnp
import numpy as np
from jax.experimental import pallas as pl
from jax.experimental.pallas import tpu as pltpu

# ---- EEGNet_mini hyper-parameters (the forward's x.shape[1]==310 branch) ----
CLASSES = 3          # classes_num
CHANS = 62           # in_channels (H after reshape)
SAMPLES = 5          # time_step (W)
F1 = 8
D = 2
F1D = F1 * D         # 16
F2 = 16
BN_EPS = 1e-5


# --------------------------- Pallas kernel ----------------------------------
def eegnet_kernel(x_ref, w1_ref, w2_ref, wc_ref, sh_ref, t1_ref, z_ref, out_ref):
    """Fused EEGNet_mini forward (eval).

    x_ref  : (TB, Chans*S)        f32 input rows (cast to bf16 in-kernel)
    w1_ref : (Chans*S, F1D*S)     bf16 folded block1 weight (pad-shift + depthwise + BNs)
    w2_ref : (F1D*S, F2*S)        bf16 folded block2 weight
    wc_ref : (F2*S, K)            bf16 classifier weight (transposed)
    sh_ref : (3, F2*S)            f32 packed shifts: row0=block1, row1=block2, row2=bias
    outputs: t1 (TB, F1D*S) bf16 block1 output, z (TB, F2*S) bf16 block2 output,
             out (TB, K) f32 logits
    """
    sh = sh_ref[...]                                        # (3, 80) f32
    x = x_ref[...].astype(jnp.bfloat16)                     # cast in-kernel (VPU, free-ish)

    # block1: one MXU matmul + affine + ELU
    y = jnp.dot(x, w1_ref[...], preferred_element_type=jnp.float32) + sh[0:1, :]
    # NOTE: exp(y)-1 (not expm1) to stay on guaranteed Mosaic-lowered primitives;
    # f32 absolute error near 0 is < 1e-7, irrelevant at our tolerance.
    t1 = jnp.where(y > 0.0, y, jnp.exp(y) - 1.0)
    t1_bf = t1.astype(jnp.bfloat16)
    t1_ref[...] = t1_bf                                     # bf16 writeback (half the bytes)

    # block2: one MXU matmul + affine + ELU (reuse the bf16 value as the MXU operand)
    v = jnp.dot(t1_bf, w2_ref[...], preferred_element_type=jnp.float32) + sh[1:2, :]
    z = jnp.where(v > 0.0, v, jnp.exp(v) - 1.0)
    z_bf = z.astype(jnp.bfloat16)
    z_ref[...] = z_bf

    # classifier: single MXU matmul + bias
    out_ref[...] = (jnp.dot(z_bf, wc_ref[...], preferred_element_type=jnp.float32)
                    + sh[2:3, :CLASSES])


# --------------------------- JAX wrapper -------------------------------------
def _round_up(n, m):
    return ((n + m - 1) // m) * m


def eegnet_mini_forward(x, folded_params, *, block_b=4096):
    """x: (B, 310) float32 — mirrors the PyTorch x.shape[1]==310 branch.

    Returns (logits_f32, [temp_bf16, output1_bf16]) like the PyTorch module
    (temp / output1 already flattened).
    """
    B = x.shape[0]
    xf = x.reshape(B, CHANS * SAMPLES)            # view; stays f32, bf16 cast is in-kernel

    if B < 16:
        nb, tb = 1, B                             # single full-extent tile, no pad / slice
    else:
        nb = max(2, pl.cdiv(B, block_b))          # >= 2 grid steps -> both v7x TCs busy
        tb = _round_up(pl.cdiv(B, nb), 8)
        nb = pl.cdiv(B, tb)
    bp = nb * tb
    if bp != B:
        xf = jnp.pad(xf, ((0, bp - B), (0, 0)))   # <= 8*nb rows of pad on the common path

    w1b, w2b, wcb, shifts = folded_params
    const = lambda i: (0, 0)
    row = lambda i: (i, 0)

    nbytes = (bp * CHANS * SAMPLES * 4                                   # x (f32) read
              + bp * F1D * SAMPLES * 2 + bp * F2 * SAMPLES * 2           # t1, z (bf16)
              + bp * CLASSES * 4                                         # logits (f32)
              + (CHANS * SAMPLES * F1D * SAMPLES
                 + F1D * SAMPLES * F2 * SAMPLES + F2 * SAMPLES * CLASSES) * 2
              + 3 * F2 * SAMPLES * 4)
    cost = pl.CostEstimate(
        flops=2 * bp * (CHANS * SAMPLES * F1D * SAMPLES
                        + F1D * SAMPLES * F2 * SAMPLES + F2 * SAMPLES * CLASSES),
        transcendentals=bp * (F1D * SAMPLES + F2 * SAMPLES),
        bytes_accessed=nbytes)

    t1, z, logits = pl.pallas_call(
        eegnet_kernel,
        grid=(nb,),
        out_shape=(
            jax.ShapeDtypeStruct((bp, F1D * SAMPLES), jnp.bfloat16),
            jax.ShapeDtypeStruct((bp, F2 * SAMPLES), jnp.bfloat16),
            jax.ShapeDtypeStruct((bp, CLASSES), jnp.float32),
        ),
        in_specs=[
            pl.BlockSpec((tb, CHANS * SAMPLES), row),
            pl.BlockSpec((CHANS * SAMPLES, F1D * SAMPLES), const),
            pl.BlockSpec((F1D * SAMPLES, F2 * SAMPLES), const),
            pl.BlockSpec((F2 * SAMPLES, CLASSES), const),
            pl.BlockSpec((3, F2 * SAMPLES), const),
        ],
        out_specs=(
            pl.BlockSpec((tb, F1D * SAMPLES), row),
            pl.BlockSpec((tb, F2 * SAMPLES), row),
            pl.BlockSpec((tb, CLASSES), row),
        ),
        compiler_params=pltpu.CompilerParams(
            dimension_semantics=("parallel",),        # batch tiles shard across v7x's 2 TCs
            vmem_limit_bytes=40 * 1024 * 1024),       # > v5e 16 MiB default, << v7x 64 MiB
        cost_estimate=cost,
    )(xf, w1b, w2b, wcb, shifts)

    if bp != B:
        t1, z, logits = t1[:B], z[:B], logits[:B]
    return logits, [t1, z]


# --------------------------- parameters --------------------------------------
def _bn(key, n):
    kg, kb, km, kv = jax.random.split(key, 4)
    gamma = 1.0 + 0.1 * jax.random.normal(kg, (n,), jnp.float32)
    beta = 0.1 * jax.random.normal(kb, (n,), jnp.float32)
    mean = 0.1 * jax.random.normal(km, (n,), jnp.float32)
    var = 0.5 + jax.random.uniform(kv, (n,), jnp.float32)
    return gamma, beta, mean, var


def init_raw_params(key):
    ks = jax.random.split(key, 10)
    return dict(
        w1=0.3 * jax.random.normal(ks[0], (F1,), jnp.float32),                 # Conv2d(1,F1,(1,1))
        wdw=jax.random.normal(ks[1], (F1D, CHANS), jnp.float32) / np.sqrt(CHANS),  # Conv2d(F1,F1D,(Chans,1),groups=F1)
        dw2=0.5 + 0.3 * jax.random.normal(ks[2], (F1D,), jnp.float32),         # Conv2d(F1D,F1D,(1,1),groups=F1D)
        wmix=jax.random.normal(ks[3], (F2, F1D), jnp.float32) / np.sqrt(F1D),  # Conv2d(F1D,F2,(1,1))
        wcls=jax.random.normal(ks[4], (CLASSES, F2 * SAMPLES), jnp.float32) / np.sqrt(F2 * SAMPLES),
        bcls=0.1 * jax.random.normal(ks[5], (CLASSES,), jnp.float32),
        bn1=_bn(ks[6], F1), bn2=_bn(ks[7], F1D), bn3=_bn(ks[8], F1D), bn4=_bn(ks[9], F2),
    )


def fold_params(raw):
    """Fold all eval-mode BNs / 1x1 convs / the ZeroPad time-shift into 3 matmul weights
    plus one packed (3, 80) per-column shift table."""
    def bn_affine(bn):
        g, b, m, v = bn
        s = g / jnp.sqrt(v + BN_EPS)
        return s, b - m * s

    # --- block1: conv1(1x1)+BN1 (per-group affine) -> pad shift -> depthwise(Chans,1) -> BN2
    s1, sh1 = bn_affine(raw['bn1'])                       # (F1,)
    a1g = jnp.repeat(s1 * raw['w1'], D)                   # (F1D,) group g = c // D
    c1g = jnp.repeat(sh1, D)                              # (F1D,)
    a2, c2 = bn_affine(raw['bn2'])                        # (F1D,)
    wdw = raw['wdw'].astype(jnp.float32)                  # (F1D, Chans)
    scale1 = a2 * a1g                                     # (F1D,)
    shift1 = a2 * c1g * jnp.sum(wdw, axis=1) + c2         # (F1D,) (additive path x Chans-sum)

    # ZeroPad2d((-1, +1)) = crop first sample / append zero, folded as a shifted diagonal:
    #   W1[h*S + wi, c*S + wo] = scale1[c] * wdw[c, h] * [wi == wo + 1]
    shift_sel = (jnp.arange(SAMPLES)[:, None] ==
                 jnp.arange(SAMPLES)[None, :] + 1).astype(jnp.float32)   # (S_in, S_out)
    w1big = jnp.einsum('ch,ij->hicj', scale1[:, None] * wdw, shift_sel)
    w1big = w1big.reshape(CHANS * SAMPLES, F1D * SAMPLES)

    # --- block2: depthwise 1x1 (dw2) + BN3 + pointwise (wmix) + BN4 folded into one matrix
    s3b, c3 = bn_affine(raw['bn3'])                       # (F1D,)
    s3 = s3b * raw['dw2']                                 # depthwise 1x1 folded into BN3 scale
    a4, c4 = bn_affine(raw['bn4'])                        # (F2,)
    wmix2 = a4[:, None] * raw['wmix'] * s3[None, :]       # (F2, F1D)
    shift2 = a4 * (raw['wmix'] @ c3) + c4                 # (F2,)
    w2big = jnp.einsum('kc,ij->cikj', wmix2, jnp.eye(SAMPLES, dtype=jnp.float32))
    w2big = w2big.reshape(F1D * SAMPLES, F2 * SAMPLES)

    # --- classifier
    wcls2 = raw['wcls'].T                                 # (F2*S, K)

    # --- packed shifts (one VMEM input instead of many tiny column vectors)
    shifts = jnp.zeros((3, F2 * SAMPLES), jnp.float32)
    shifts = shifts.at[0].set(jnp.repeat(shift1, SAMPLES))
    shifts = shifts.at[1].set(jnp.repeat(shift2, SAMPLES))
    shifts = shifts.at[2, :CLASSES].set(raw['bcls'])

    bf16 = jnp.bfloat16
    return (w1big.astype(bf16), w2big.astype(bf16), wcls2.astype(bf16), shifts)


# --------------------------- pure-JAX reference ------------------------------
def reference_forward(x, raw):
    B = x.shape[0]

    def bn(h, p):
        g, b, m, v = p
        sh = [1] * h.ndim
        sh[1] = -1
        return (h - m.reshape(sh)) / jnp.sqrt(v.reshape(sh) + BN_EPS) * g.reshape(sh) + b.reshape(sh)

    elu = lambda h: jnp.where(h > 0, h, jnp.exp(h) - 1.0)

    x4 = x.reshape(B, CHANS, SAMPLES)[:, None]                 # (B,1,Chans,S)
    xp = jnp.concatenate([x4[..., 1:], jnp.zeros_like(x4[..., :1])], axis=-1)
    h = raw['w1'][None, :, None, None] * xp                    # Conv2d(1,F1,(1,1))
    h = bn(h, raw['bn1'])
    hg = h[:, jnp.repeat(jnp.arange(F1), D)]                   # group-select input channels
    y = jnp.einsum('ch,bchw->bcw', raw['wdw'], hg)             # depthwise (Chans,1) conv
    y = bn(y, raw['bn2'])
    t1 = elu(y)
    temp = t1.reshape(B, -1)
    u = raw['dw2'][None, :, None] * t1                         # depthwise 1x1 conv
    u = bn(u, raw['bn3'])
    v = jnp.einsum('kc,bcw->bkw', raw['wmix'], u)              # pointwise conv
    v = bn(v, raw['bn4'])
    z = elu(v)
    out1 = z.reshape(B, -1)
    logits = out1 @ raw['wcls'].T + raw['bcls'][None]
    return logits, temp, out1


# --------------------------- main ---------------------------------------------
if __name__ == "__main__":
    key = jax.random.PRNGKey(0)
    kx, kp = jax.random.split(key)
    B = 2
    x = jax.random.normal(kx, (B, CHANS * SAMPLES), jnp.float32)   # (2, 310)

    raw = init_raw_params(kp)
    folded = fold_params(raw)

    logits, (temp, out1) = eegnet_mini_forward(x, folded)
    jax.block_until_ready((logits, temp, out1))

    ref_logits, ref_temp, ref_out1 = reference_forward(x, raw)
    temp_f = np.asarray(temp.astype(jnp.float32))
    out1_f = np.asarray(out1.astype(jnp.float32))
    # bf16 MXU inputs + bf16 temp/output1 writeback (f32 accumulation) -> ~2^-8 relative
    # rounding; 2e-2 covers it.
    assert np.allclose(temp_f, np.asarray(ref_temp), atol=2e-2, rtol=2e-2)
    assert np.allclose(out1_f, np.asarray(ref_out1), atol=2e-2, rtol=2e-2)
    assert np.allclose(np.asarray(logits), np.asarray(ref_logits), atol=2e-2, rtol=2e-2)

    print("KERNEL_OK")
</pallas_src>

<mosaic_0001>
module attributes {stable_mosaic.version = 11 : i64} {
  func.func @eegnet_kernel(%arg0: i32, %arg1: memref<2x310xf32, #tpu.memory_space<vmem>>, %arg2: memref<310x80xbf16, #tpu.memory_space<vmem>>, %arg3: memref<80x80xbf16, #tpu.memory_space<vmem>>, %arg4: memref<80x3xbf16, #tpu.memory_space<vmem>>, %arg5: memref<3x80xf32, #tpu.memory_space<vmem>>, %arg6: memref<2x80xbf16, #tpu.memory_space<vmem>>, %arg7: memref<2x80xbf16, #tpu.memory_space<vmem>>, %arg8: memref<2x3xf32, #tpu.memory_space<vmem>>) attributes {dimension_semantics = [#tpu.dimension_semantics<parallel>], iteration_bounds = array<i64: 1>, scalar_prefetch = 0 : i64, scratch_operands = 0 : i64, tpu.core_type = #tpu.core_type<tc>, window_params = [{transform_indices = @transform_0, window_bounds = array<i64: 2, 310>}, {pipeline_mode = #tpu.pipeline_mode<synchronous>, transform_indices = @transform_1, window_bounds = array<i64: 310, 80>}, {pipeline_mode = #tpu.pipeline_mode<synchronous>, transform_indices = @transform_2, window_bounds = array<i64: 80, 80>}, {pipeline_mode = #tpu.pipeline_mode<synchronous>, transform_indices = @transform_3, window_bounds = array<i64: 80, 3>}, {pipeline_mode = #tpu.pipeline_mode<synchronous>, transform_indices = @transform_4, window_bounds = array<i64: 3, 80>}, {transform_indices = @transform_5, window_bounds = array<i64: 2, 80>}, {transform_indices = @transform_6, window_bounds = array<i64: 2, 80>}, {transform_indices = @transform_7, window_bounds = array<i64: 2, 3>}]} {
    %c0 = arith.constant 0 : index
    %c0_0 = arith.constant 0 : index
    %0 = vector.load %arg5[%c0, %c0_0] : memref<3x80xf32, #tpu.memory_space<vmem>>, vector<3x80xf32>
    %c0_1 = arith.constant 0 : index
    %c0_2 = arith.constant 0 : index
    %1 = vector.load %arg1[%c0_1, %c0_2] : memref<2x310xf32, #tpu.memory_space<vmem>>, vector<2x310xf32>
    %2 = arith.truncf %1 : vector<2x310xf32> to vector<2x310xbf16>
    %c0_3 = arith.constant 0 : index
    %c0_4 = arith.constant 0 : index
    %3 = vector.load %arg2[%c0_3, %c0_4] : memref<310x80xbf16, #tpu.memory_space<vmem>>, vector<310x80xbf16>
    %cst = arith.constant dense<0.000000e+00> : vector<2x80xf32>
    %4 = tpu.matmul %2, %3, %cst {dimension_numbers = #tpu.dot_dimension_numbers<[1], [0], [0], [1], [0, 0, 1, 1], [], []>} : vector<2x310xbf16>, vector<310x80xbf16>, vector<2x80xf32> -> vector<2x80xf32>
    %5 = vector.extract_strided_slice %0 {offsets = [0, 0], sizes = [1, 80], strides = [1, 1]} : vector<3x80xf32> to vector<1x80xf32>
    %6 = vector.broadcast %5 : vector<1x80xf32> to vector<2x80xf32>
    %7 = arith.addf %4, %6 : vector<2x80xf32>
    %cst_5 = arith.constant 0.000000e+00 : f32
    %8 = vector.broadcast %cst_5 : f32 to vector<2x80xf32>
    %9 = arith.cmpf ogt, %7, %8 : vector<2x80xf32>
    %10 = math.exp %7 : vector<2x80xf32>
    %cst_6 = arith.constant 1.000000e+00 : f32
    %11 = vector.broadcast %cst_6 : f32 to vector<2x80xf32>
    %12 = arith.subf %10, %11 : vector<2x80xf32>
    %13 = arith.select %9, %7, %12 : vector<2x80xi1>, vector<2x80xf32>
    %14 = arith.truncf %13 : vector<2x80xf32> to vector<2x80xbf16>
    %c0_7 = arith.constant 0 : index
    %c0_8 = arith.constant 0 : index
    %15 = vector.load %arg6[%c0_7, %c0_8] : memref<2x80xbf16, #tpu.memory_space<vmem>>, vector<2x80xbf16>
    tpu.vector_store %arg6[%c0_7, %c0_8], %14 {strides = array<i32>} : memref<2x80xbf16, #tpu.memory_space<vmem>>, vector<2x80xbf16>,
    %c0_9 = arith.constant 0 : index
    %c0_10 = arith.constant 0 : index
    %16 = vector.load %arg3[%c0_9, %c0_10] : memref<80x80xbf16, #tpu.memory_space<vmem>>, vector<80x80xbf16>
    %cst_11 = arith.constant dense<0.000000e+00> : vector<2x80xf32>
    %17 = tpu.matmul %14, %16, %cst_11 {dimension_numbers = #tpu.dot_dimension_numbers<[1], [0], [0], [1], [0, 0, 1, 1], [], []>} : vector<2x80xbf16>, vector<80x80xbf16>, vector<2x80xf32> -> vector<2x80xf32>
    %18 = vector.extract_strided_slice %0 {offsets = [1, 0], sizes = [1, 80], strides = [1, 1]} : vector<3x80xf32> to vector<1x80xf32>
    %19 = vector.broadcast %18 : vector<1x80xf32> to vector<2x80xf32>
    %20 = arith.addf %17, %19 : vector<2x80xf32>
    %cst_12 = arith.constant 0.000000e+00 : f32
    %21 = vector.broadcast %cst_12 : f32 to vector<2x80xf32>
    %22 = arith.cmpf ogt, %20, %21 : vector<2x80xf32>
    %23 = math.exp %20 : vector<2x80xf32>
    %cst_13 = arith.constant 1.000000e+00 : f32
    %24 = vector.broadcast %cst_13 : f32 to vector<2x80xf32>
    %25 = arith.subf %23, %24 : vector<2x80xf32>
    %26 = arith.select %22, %20, %25 : vector<2x80xi1>, vector<2x80xf32>
    %27 = arith.truncf %26 : vector<2x80xf32> to vector<2x80xbf16>
    %c0_14 = arith.constant 0 : index
    %c0_15 = arith.constant 0 : index
    %28 = vector.load %arg7[%c0_14, %c0_15] : memref<2x80xbf16, #tpu.memory_space<vmem>>, vector<2x80xbf16>
    tpu.vector_store %arg7[%c0_14, %c0_15], %27 {strides = array<i32>} : memref<2x80xbf16, #tpu.memory_space<vmem>>, vector<2x80xbf16>,
    %c0_16 = arith.constant 0 : index
    %c0_17 = arith.constant 0 : index
    %29 = vector.load %arg4[%c0_16, %c0_17] : memref<80x3xbf16, #tpu.memory_space<vmem>>, vector<80x3xbf16>
    %cst_18 = arith.constant dense<0.000000e+00> : vector<2x3xf32>
    %30 = tpu.matmul %27, %29, %cst_18 {dimension_numbers = #tpu.dot_dimension_numbers<[1], [0], [0], [1], [0, 0, 1, 1], [], []>} : vector<2x80xbf16>, vector<80x3xbf16>, vector<2x3xf32> -> vector<2x3xf32>
    %31 = vector.extract_strided_slice %0 {offsets = [2, 0], sizes = [1, 3], strides = [1, 1]} : vector<3x80xf32> to vector<1x3xf32>
    %32 = vector.broadcast %31 : vector<1x3xf32> to vector<2x3xf32>
    %33 = arith.addf %30, %32 : vector<2x3xf32>
    %c0_19 = arith.constant 0 : index
    %c0_20 = arith.constant 0 : index
    %34 = vector.load %arg8[%c0_19, %c0_20] : memref<2x3xf32, #tpu.memory_space<vmem>>, vector<2x3xf32>
    tpu.vector_store %arg8[%c0_19, %c0_20], %33 {strides = array<i32>} : memref<2x3xf32, #tpu.memory_space<vmem>>, vector<2x3xf32>,
    return
  }
  func.func @transform_0(%arg0: i32) -> (i32, i32) {
    %c0_i32 = arith.constant 0 : i32
    %c0_i32_0 = arith.constant 0 : i32
    return %arg0, %c0_i32 : i32, i32
  }
  func.func @transform_1(%arg0: i32) -> (i32, i32) {
    %c0_i32 = arith.constant 0 : i32
    %c0_i32_0 = arith.constant 0 : i32
    %c0_i32_1 = arith.constant 0 : i32
    return %c0_i32, %c0_i32_0 : i32, i32
  }
  func.func @transform_2(%arg0: i32) -> (i32, i32) {
    %c0_i32 = arith.constant 0 : i32
    %c0_i32_0 = arith.constant 0 : i32
    %c0_i32_1 = arith.constant 0 : i32
    return %c0_i32, %c0_i32_0 : i32, i32
  }
  func.func @transform_3(%arg0: i32) -> (i32, i32) {
    %c0_i32 = arith.constant 0 : i32
    %c0_i32_0 = arith.constant 0 : i32
    %c0_i32_1 = arith.constant 0 : i32
    return %c0_i32, %c0_i32_0 : i32, i32
  }
  func.func @transform_4(%arg0: i32) -> (i32, i32) {
    %c0_i32 = arith.constant 0 : i32
    %c0_i32_0 = arith.constant 0 : i32
    %c0_i32_1 = arith.constant 0 : i32
    return %c0_i32, %c0_i32_0 : i32, i32
  }
  func.func @transform_5(%arg0: i32) -> (i32, i32) {
    %c0_i32 = arith.constant 0 : i32
    %c0_i32_0 = arith.constant 0 : i32
    return %arg0, %c0_i32 : i32, i32
  }
  func.func @transform_6(%arg0: i32) -> (i32, i32) {
    %c0_i32 = arith.constant 0 : i32
    %c0_i32_0 = arith.constant 0 : i32
    return %arg0, %c0_i32 : i32, i32
  }
  func.func @transform_7(%arg0: i32) -> (i32, i32) {
    %c0_i32 = arith.constant 0 : i32
    %c0_i32_0 = arith.constant 0 : i32
    return %arg0, %c0_i32 : i32, i32
  }
}

</mosaic_0001>

<bundles_post_ra>
// kernel: tpu_custom_call.1
= control target key start
LH: loop header
LB: loop body
LE: loop exit
PB: predicated region body
PF: predicated region fallthrough
CT: control target
= control target key end

     0   :  { %13 = vsyncpa [#allocation3], 0  ;;  %v757_v2 = vmov 0.0   ;;  %vm758_vm0 = vmmov 0   ;;  %v33_v13 = vlaneseq  ;;  %vm215_vm1 = vcmask 1042432   ;;  %s972_s0 = inlined_call_operand.vmem [shape: f32[2,310], index: 0, kind: input, shape index: {}]   ;;  %s973_s1 = inlined_call_operand.vmem [shape: bf16[310,80], index: 1, kind: input, shape index: {}]   ;;  %s974_s2 = inlined_call_operand.vmem [shape: bf16[80,80], index: 2, kind: input, shape index: {}]   ;;  %s975_s3 = inlined_call_operand.vmem [shape: bf16[80,3], index: 3, kind: input, shape index: {}]   ;;  %s976_s4 = inlined_call_operand.vmem [shape: f32[3,80], index: 4, kind: input, shape index: {}]   ;;  %s977_s5 = inlined_call_operand.hbm [shape: bf16[2,80], index: 5, kind: output, shape index: {0}]   ;;  %s978_s6 = inlined_call_operand.hbm [shape: bf16[2,80], index: 6, kind: output, shape index: {1}]   ;;  %s979_s7 = inlined_call_operand.hbm [shape: f32[2,3], index: 7, kind: output, shape index: {2}]  }
   0x1   :  { %v652_v0 = vld [vmem:[%s973_s1 + $0x40] sm:$0xff]   ;;  %606 = vmatprep.subr.bf16.mxu1 %v757_v2  ;;  %v654_v3 = vld [vmem:[%s973_s1 + $0x48] sm:$0xff]   ;;  %v656_v5 = vld [vmem:[%s973_s1 + $0x50] sm:$0xff]   ;;  %614 = vmatprep.mubr.msk.bf16.mxu1 %vm758_vm0, %v757_v2  ;;  %vm211_vm2 = vcmask 441344   ;;  %v759_v20 = vmov 1983009808  }
   0x2   :  { %v653_v1 = vld [vmem:[%s973_s1] sm:$0xff]   ;;  %567 = vmatprep.subr.bf16.mxu0 %v652_v0  ;;  %v655_v4 = vld [vmem:[%s973_s1 + $0x8] sm:$0xff]   ;;  %v657_v6 = vld [vmem:[%s973_s1 + $0x10] sm:$0xff]   ;;  %v853_v17 = vshrl.u32 %v33_v13, 7  ;;  %v31_v21 = vunpack.c.l.s4 %v759_v20 }
   0x3   :  { %568 = vmatpush3.bf16.msra.mxu0 %v653_v1  ;;  %v658_v7 = vld [vmem:[%s973_s1 + $0x58] sm:$0xff]   ;;  %v662_v8 = vld [vmem:[%s973_s1 + $0x80] sm:$0xff]   ;;  %v665_v11 = vld [vmem:[%s973_s1 + $0x88] sm:$0xff]  }
   0x4   :  { %569 = vmatprep.subr.bf16.mxu0 %v654_v3  ;;  %v659_v9 = vld [vmem:[%s973_s1 + $0x18] sm:$0xff]   ;;  %v660_v10 = vld [vmem:[%s973_s1 + $0x60] sm:$0xff]   ;;  %607 = vmatpush3.bf16.msra.mxu1 %v662_v8  ;;  %v663_v14 = vld [vmem:[%s973_s1 + $0x68] sm:$0xff]   ;;  %v32_v26 = vunpack.c.0.s8 %v31_v21 }
   0x5   :  { %608 = vmatprep.subr.bf16.mxu1 %v757_v2  ;;  %v661_v12 = vld [vmem:[%s973_s1 + $0x20] sm:$0xff]   ;;  %v668_v15 = vld [vmem:[%s973_s1 + $0x90] sm:$0xff]   ;;  %v664_v16 = vld [vmem:[%s973_s1 + $0x28] sm:$0xff]  }
   0x6   :  { %v27_v18 = vld [vmem:[%s972_s0] sm:$0x3f]  ;;  %v666_v19 = vld [vmem:[%s973_s1 + $0x70] sm:$0xff]   ;;  %v672_v22 = vld [vmem:[%s973_s1 + $0x98] ss:$0 sps:$4 sm:$0x77]   ;;  %v35_v28 = vsub.s32 %v32_v26, %v853_v17 }
   0x7   :  { %570 = vmatpush3.bf16.msra.mxu0 %v655_v4  ;;  %v667_v23 = vld [vmem:[%s973_s1 + $0x30] sm:$0xff]   ;;  %v669_v24 = vld [vmem:[%s973_s1 + $0x78] sm:$0xff]   ;;  %v29_v25 = vcombine.high %v27_v18, %v27_v18  ;;  %v217_v27 = vsel %vm215_vm1, %v672_v22, 0 }
   0x8   :  { %571 = vmatprep.subr.bf16.mxu0 %v656_v5  ;;  %609 = vmatpush3.bf16.msra.mxu1 %v665_v11  ;;  %v670_v29 = vld [vmem:[%s973_s1 + $0x38] sm:$0xff]   ;;  %v36_v30 = vrot.slane %v27_v18, %v35_v28 }
   0x9   :  { %610 = vmatprep.subr.bf16.mxu1 %v757_v2  ;;  %v43_v31 = vrot.slane %v29_v25, %v35_v28 }
   0xb   :  { %572 = vmatpush3.bf16.msra.mxu0 %v657_v6 }
   0xc   :  { %573 = vmatprep.subr.bf16.mxu0 %v658_v7  ;;  %611 = vmatpush3.bf16.msra.mxu1 %v668_v15 }
   0xd   :  { %612 = vmatprep.subr.bf16.mxu1 %v757_v2 }
   0xf   :  { %574 = vmatpush3.bf16.msra.mxu0 %v659_v9 }
  0x10   :  { %575 = vmatprep.subr.bf16.mxu0 %v660_v10  ;;  %613 = vmatpush3.bf16.msra.mxu1 %v217_v27 }
  0x11   :  { %618 = vmatprep.subr.bf16.mxu1 %v757_v2 }
  0x13   :  { %576 = vmatpush3.bf16.msra.mxu0 %v661_v12 }
  0x14   :  { %577 = vmatprep.subr.bf16.mxu0 %v663_v14 }
  0x17   :  { %578 = vmatpush3.bf16.msra.mxu0 %v664_v16 }
  0x18   :  { %579 = vmatprep.subr.bf16.mxu0 %v666_v19 }
  0x1b   :  { %580 = vmatpush3.bf16.msra.mxu0 %v667_v23 }
  0x1c   :  { %14 = vsyncpa [#allocation5], 0  ;;  %581 = vmatprep.subr.bf16.mxu0 %v669_v24  ;;  %v44_v32 = vcombine.high %v36_v30, %v36_v30  ;;  %v50_v33 = vpack.c.bf16 %v43_v31, %v43_v31  ;;  %v48_v35 = vpack.c.bf16 %v36_v30, %v36_v30  ;;  %v673_v36 = vld [vmem:[%s974_s2] sm:$0xff]   ;;  %v674_v37 = vld [vmem:[%s974_s2 + $0x8] sm:$0xff]   ;;  %v92_v41 = vsub.s32 0, %v853_v17  ;;  %s761_s0 = smov [#allocation2]  }
  0x1d   :  { %v675_v38 = vld [vmem:[%s974_s2 + $0x10] sm:$0xff]   ;;  %v676_v39 = vld [vmem:[%s974_s2 + $0x18] sm:$0xff]   ;;  %v677_v40 = vld [vmem:[%s974_s2 + $0x20] sm:$0xff]   ;;  %vm351_vm4 = vcmask 654336   ;;  %vm305_vm5 = vcmask 647168   ;;  %v319_v1 = vsub.s32 1, %v853_v17 }
  0x1e   :  { %v49_v34 = vpack.c.bf16 %v44_v32, %v44_v32  ;;  %615 = vmatmul.mubr.msk.bf16.vlgmr.msra.gmra.mrb[0].mxu1 %vm211_vm2, %v50_v33  ;;  %v906_v43 = vld [vmem:[%s976_s4] sm:$0x7]  ;;  %v679_v61 = vld [vmem:[%s975_s3 + $0x8] sm:$0xff]   ;;  %v680_v62 = vld [vmem:[%s975_s3 + $0x10] sm:$0xff]   ;;  %s497_s16 = sshll.u32 %s761_s0, 4  ;;  %s498_s16 = int_to_ptr.vmem [resolvable:$true] %s497_s16 }
  0x1f   :  { %582 = vmatpush3.bf16.msra.mxu0 %v670_v29  ;;  %628 = vmatprep.mubr.msk.bf16.mxu1 %vm758_vm0, %v757_v2  ;;  %v93_v48 = vrot.slane %v906_v43, %v92_v41  ;;  %v678_v60 = vld [vmem:[%s975_s3] sm:$0xff]   ;;  %v681_v63 = vld [vmem:[%s975_s3 + $0x18] sm:$0xff]   ;;  %v320_v3 = vrot.slane %v906_v43, %v319_v1 }
  0x20   :  { %251 = vmatprep.mubr.bf16.mxu0 %v49_v34  ;;  %632 = vmatprep.subr.bf16.mxu0 %v757_v2  ;;  %v682_v0 = vld [vmem:[%s975_s3 + $0x20] sm:$0xff]   ;;  %s760_s3 = smov [#allocation4]  }
  0x21   :  { %619 = vmatpush3.bf16.msra.mxu1 %v673_v36  ;;  %s507_s15 = sshll.u32 %s760_s3, 4  ;;  %s508_s15 = int_to_ptr.vmem [resolvable:$true] %s507_s15 }
  0x22   :  { %252 = vmatmul.mubr.bf16.vlgmr.msra.gmra.mrb[0].mxu0 %v48_v35  ;;  %620 = vmatprep.subr.bf16.mxu1 %v757_v2  ;;  %s687_s17 = scalar_lea.vmem %s508_s15, 16  ;;  %s691_s18 = scalar_lea.vmem %s508_s15, 32 }
  0x23   :  { %642 = vmatprep.mubr.msk.bf16.mxu0 %vm758_vm0, %v757_v2  ;;  %633 = vmatpush3.bf16.msra.mxu0 %v678_v60  ;;  %p688_p0 = scmp.ne.s32.totalorder %s508_s15, %s687_s17  ;;  %p692_p1 = scmp.lt.s32.totalorder %s508_s15, %s508_s15 }
  0x24   :  { %634 = vmatprep.subr.bf16.mxu0 %v757_v2  ;;  %p693_p2 = scmp.lt.s32.totalorder %s691_s18, %s687_s17 }
  0x25   :  { %621 = vmatpush3.bf16.msra.mxu1 %v674_v37 }
  0x26   :  { %622 = vmatprep.subr.bf16.mxu1 %v757_v2  ;;  %p694_p3 = por %p693_p2, %p692_p1 }
  0x27   :  { %635 = vmatpush3.bf16.msra.mxu0 %v679_v61 }
  0x28   :  { %636 = vmatprep.subr.bf16.mxu0 %v757_v2  ;;  %p695_p4 = pnand %p694_p3, %p688_p0 }
  0x29   :  { %623 = vmatpush3.bf16.msra.mxu1 %v675_v38 }
  0x2a   :  { %624 = vmatprep.subr.bf16.mxu1 %v757_v2 }
  0x2b   :  { %637 = vmatpush3.bf16.msra.mxu0 %v680_v62 }
  0x2c   :  { %638 = vmatprep.subr.bf16.mxu0 %v757_v2 }
  0x2d   :  { %625 = vmatpush3.bf16.msra.mxu1 %v676_v39 }
  0x2e   :  { %626 = vmatprep.subr.bf16.mxu1 %v757_v2 }
  0x2f   :  { %639 = vmatpush3.bf16.msra.mxu0 %v681_v63 }
  0x30   :  { %640 = vmatprep.subr.bf16.mxu0 %v757_v2 }
  0x31   :  { %627 = vmatpush3.bf16.msra.mxu1 %v677_v40 }
  0x33   :  { %641 = vmatpush3.bf16.msra.mxu0 %v682_v0 }
  0xf1   :  { %v293_v42 = vpop.f32.mrb[0].mxu1 }
  0xf2   :  { %v616_v44 = vpop.f32.mrb[1].mxu1 }
  0xf3   :  { %v296_v45 = vpop.f32.mrb[2].mxu1 }
  0xf4   :  { %v617_v46 = vpop.f32.mrb[3].mxu1 }
  0xf5   :  { %v583_v47 = vpop.f32.mrb[0].mxu0 }
  0xf6   :  { %v584_v49 = vpop.f32.mrb[1].mxu0 }
  0xf7   :  { %v585_v50 = vadd.f32 %v584_v49, %v583_v47  ;;  %v586_v51 = vpop.f32.mrb[2].mxu0 }
  0xf8   :  { %v587_v52 = vpop.f32.mrb[3].mxu0 }
  0xf9   :  { %v254_v53 = vadd.f32 %v585_v50, %v93_v48 }
  0xfb   :  { %v294_v54 = vadd.f32 %v293_v42, %v254_v53 }
  0xfd   :  { %v300_v55 = vmul.f32 1.442695, %v294_v54  ;;  %vm299_vm3 = vcmp.gt.f32.partialorder %v294_v54, 0.0 }
  0xff   :  { %683 = vpow2.f32 %v300_v55 }
 0x109   :  { %v684_v56 = vpop.eup %683 }
 0x10a   :  { %v553_v57 = vadd.f32 -1.0, %v684_v56 }
 0x10c   :  { %v303_v58 = vsel %vm299_vm3, %v294_v54, %v553_v57 }
 0x10d   :  { %v304_v59 = vpack.c.bf16 %v303_v58, %v303_v58 }
 0x10f   :  { %629 = vmatmul.mubr.msk.bf16.vlgmr.msra.gmra.mrb[4].mxu1 %vm351_vm4, %v304_v59  ;;  %306 = vst.msk [vmem:[#allocation2] sm:$0x1] %vm305_vm5, %v304_v59 }
 0x1e2   :  { %v389_v4 = vpop.f32.mrb[4].mxu1 }
 0x1e3   :  { %v390_v5 = vadd.f32 %v389_v4, %v320_v3  ;;  %v630_v6 = vpop.f32.mrb[5].mxu1 }
 0x1e4   :  { %v392_v7 = vpop.f32.mrb[6].mxu1 }
 0x1e5   :  { %v396_v8 = vmul.f32 1.442695, %v390_v5  ;;  %v631_v9 = vpop.f32.mrb[7].mxu1  ;;  %vm395_vm6 = vcmp.gt.f32.partialorder %v390_v5, 0.0 }
 0x1e7   :  { %685 = vpow2.f32 %v396_v8 }
 0x1f1   :  { %v686_v10 = vpop.eup %685 }
 0x1f2   :  { %v560_v11 = vadd.f32 -1.0, %v686_v10 }
 0x1f4   :  { %v399_v2 = vsel %vm395_vm6, %v390_v5, %v560_v11 }
 0x1f5   :  { %v400_v12 = vpack.c.bf16 %v399_v2, %v399_v2 }
 0x1f7   :  { %643 = vmatmul.mubr.msk.bf16.vlgmr.msra.gmra.mrb[4].mxu0 %vm351_vm4, %v400_v12  ;;  %401 = vst.msk [vmem:[#allocation4] sm:$0x1] %vm305_vm5, %v400_v12 }
 0x1f8   :  { %698 = shalt.err (!%p695_p4)
}
 0x1f9   :  { %s699_s20 = scalar_lea.hbm %s978_s6, 16 }
 0x1fa   :  { %p700_p5 = scmp.ne.s32.totalorder %s978_s6, %s699_s20  ;;  %p703_p6 = scmp.lt.u32.totalorder %s699_s20, %s978_s6 }
 0x1fc   :  { %p705_p7 = pnand %p703_p6, %p700_p5 }
 0x1fe   :  { %708 = shalt.err (!%p705_p7)
}
 0x1ff   :  { %510 = dma.vmem_to_hbm [thread:$0]  %s508_s15, 16, %s978_s6, [#allocation5]  }
 0x200   :  { %s709_s27 = scalar_lea.vmem %s498_s16, 16  ;;  %s713_s28 = scalar_lea.vmem %s498_s16, 32 }
 0x201   :  { %p710_p8 = scmp.ne.s32.totalorder %s498_s16, %s709_s27  ;;  %p714_p9 = scmp.lt.s32.totalorder %s498_s16, %s498_s16 }
 0x202   :  { %p715_p10 = scmp.lt.s32.totalorder %s713_s28, %s709_s27 }
 0x204   :  { %p716_p11 = por %p715_p10, %p714_p9 }
 0x206   :  { %p717_p12 = pnand %p716_p11, %p710_p8 }
 0x208   :  { %720 = shalt.err (!%p717_p12)
}
 0x209   :  { %s721_s4 = scalar_lea.hbm %s977_s5, 16 }
 0x20a   :  { %p722_p13 = scmp.ne.s32.totalorder %s977_s5, %s721_s4  ;;  %p725_p0 = scmp.lt.u32.totalorder %s721_s4, %s977_s5 }
 0x20c   :  { %p727_p1 = pnand %p725_p0, %p722_p13 }
 0x20e   :  { %730 = shalt.err (!%p727_p1)
}
 0x20f   :  { %500 = dma.vmem_to_hbm [thread:$0]  %s498_s16, 16, %s977_s5, [#allocation3]   ;;  %v414_v13 = vsub.s32 2, %v853_v17  ;;  %vm489_vm7 = vcmask 17408  }
 0x210   :  { %s762_s12 = smov [#allocation6]  }
 0x211   :  { %v415_v14 = vrot.slane %v906_v43, %v414_v13  ;;  %s517_s13 = sshll.u32 %s762_s12, 4  ;;  %s518_s13 = int_to_ptr.vmem [resolvable:$true] %s517_s13 }
 0x212   :  { %s731_s14 = scalar_lea.vmem %s518_s13, 32  ;;  %p736_p3 = scmp.lt.s32.totalorder %s518_s13, %s518_s13 }
 0x213   :  { %p732_p2 = scmp.ne.s32.totalorder %s518_s13, %s731_s14  ;;  %p737_p4 = scmp.lt.s32.totalorder %s731_s14, %s731_s14 }
 0x215   :  { %p738_p5 = por %p737_p4, %p736_p3 }
 0x217   :  { %p739_p6 = pnand %p738_p5, %p732_p2 }
 0x2ca   :  { %v483_v15 = vpop.f32.mrb[4].mxu0 }
 0x2cb   :  { %v484_v16 = vadd.f32 %v483_v15, %v415_v14  ;;  %v644_v18 = vpop.f32.mrb[5].mxu0 }
 0x2cc   :  { %v486_v19 = vpop.f32.mrb[6].mxu0 }
 0x2cd   :  { %v645_v20 = vpop.f32.mrb[7].mxu0  ;;  %490 = vst.msk [vmem:[#allocation6] sm:$0x3] %vm489_vm7, %v484_v16 }
 0x2ce   :  { %742 = shalt.err (!%p739_p6)
}
 0x2cf   :  { %s743_s15 = scalar_lea.hbm %s979_s7, 32 }
 0x2d0   :  { %p744_p7 = scmp.ne.s32.totalorder %s979_s7, %s743_s15  ;;  %p747_p8 = scmp.lt.u32.totalorder %s743_s15, %s979_s7 }
 0x2d2   :  { %p749_p9 = pnand %p747_p8, %p744_p7 }
 0x2d4   :  { %752 = shalt.err (!%p749_p9)
}
 0x2d5   :  { %520 = dma.vmem_to_hbm [thread:$0]  %s518_s13, 32, %s979_s7, [#allocation5]  }
 0x2d6   :  { %753 = dma.done.wait [#allocation3], 16  }
 0x2d7   :  { %754 = vsyncadd [#allocation3], 4294967280 }
 0x2d8   :  { %755 = dma.done.wait [#allocation5], 48  }
 0x2d9   :  { %756 = vsyncadd [#allocation5], 4294967248 }
 0x2da   :  { %530 = vsyncpa [#allocation3], 1 }
 0x2db   :  { %531 = vsyncpa [#allocation5], 1 }

</bundles_post_ra>
